<compile_context>
chip_gen: v5e
topology: v5e:2x2
jax: 0.10.0
libtpu: 0.0.40
codegen_flags: <defaults>
</compile_context>

<pallas_src>
import functools

import jax
import jax.numpy as jnp
from jax import lax
from jax.experimental import pallas as pl
from jax.experimental.pallas import tpu as pltpu


# ------------------------------------------------------------------------
# VMEM budgeting (generation aware: v5e/v6e have 128 MiB / TC, v7x only 64).
# ------------------------------------------------------------------------
def _vmem_params():
    """Returns (working_set_budget_bytes, vmem_limit_bytes, target_x_bytes)."""
    cap = None
    try:
        info = pltpu.get_tpu_info()
        for name in ("vmem_capacity_bytes", "vmem_size_bytes", "vmem_bytes"):
            cap = getattr(info, name, None)
            if cap:
                break
    except Exception:
        cap = None
    if not cap:
        cap = 64 * 1024 * 1024                      # conservative (v7x-sized)
    if cap >= 100 * 1024 * 1024:                    # v5e / v6e: 128 MiB VMEM
        return 80 << 20, 100 << 20, 8 << 20
    return 36 << 20, 50 << 20, 8 << 20              # v7x: 64 MiB VMEM


def _round_up(v, m):
    return ((v + m - 1) // m) * m


def _round_down(v, m):
    return max(m, (v // m) * m)


def _pick_tile_rows(n, row_ws_bytes, row_x_bytes, align, budget, target_x,
                    min_steps=4):
    """Rows per block along an axis of extent `n` (the reduced axis is always
    fully resident inside every block).  Byte-capped, not element-capped."""
    t = min(budget // max(row_ws_bytes, 1), target_x // max(row_x_bytes, 1))
    t = max(t, align)
    # Keep >= min_steps grid steps when the array is big enough that the extra
    # steps amortize their ~0.35us overhead (DMA/compute overlap + v7x's two
    # TensorCores each get >= 2 blocks).
    if n * row_x_bytes >= (4 << 20) and n >= min_steps * align:
        t = min(t, _round_up(pl.cdiv(n, min_steps), align))
    if t >= n:
        return n
    return _round_down(t, align)


# ------------------------------------------------------------------------
# Kernels
# ------------------------------------------------------------------------
def _ln_lane_kernel(x_ref, w_ref, b_ref, o_ref, *, eps, inv_n):
    # x_ref: (tile_m, C); reduce over the lane (last) axis.  w/b: (1, C).
    x = x_ref[...].astype(jnp.float32)
    s1 = jnp.sum(x, axis=-1, keepdims=True)
    s2 = jnp.sum(x * x, axis=-1, keepdims=True)
    mean = s1 * inv_n
    var = jnp.maximum(s2 * inv_n - mean * mean, 0.0)   # E[x^2]-mean^2, clamped
    inv = lax.rsqrt(var + eps)
    w = w_ref[...].astype(jnp.float32)
    b = b_ref[...].astype(jnp.float32)
    o_ref[...] = ((x - mean) * inv * w + b).astype(o_ref.dtype)


def _ln_packed_kernel(x_ref, gmat_ref, w_ref, b_ref, o_ref, *, eps, inv_n):
    # x_ref: (tile_m, 128); each 128-lane row packs 128/C independent groups of
    # C channels.  gmat_ref: (128, 128) block-diagonal ones; x @ gmat puts each
    # group's sum on all of that group's lanes (MXU, otherwise idle).
    x = x_ref[...].astype(jnp.float32)
    g = gmat_ref[...]
    s1 = jnp.dot(x, g, preferred_element_type=jnp.float32)
    s2 = jnp.dot(x * x, g, preferred_element_type=jnp.float32)
    mean = s1 * inv_n
    var = jnp.maximum(s2 * inv_n - mean * mean, 0.0)
    inv = lax.rsqrt(var + eps)
    o_ref[...] = ((x - mean) * inv * w_ref[...] + b_ref[...]).astype(o_ref.dtype)


def _ln_cf_kernel(x_ref, w_ref, b_ref, o_ref, *, eps, inv_n, channels):
    # x_ref: (1, C, th, tw) NCHW block.  w_ref/b_ref: (C,) f32 in SMEM.
    # Channels are an un-tiled block dim, so the reduction is a running-sum
    # loop over channel planes (VPU adds); the spatial tile stays lane-dense.
    th, tw = x_ref.shape[2], x_ref.shape[3]
    zero = jnp.zeros((th, tw), jnp.float32)

    def stats_body(c, carry):
        s1, s2 = carry
        xc = x_ref[0, c].astype(jnp.float32)
        return s1 + xc, s2 + xc * xc

    s1, s2 = lax.fori_loop(0, channels, stats_body, (zero, zero),
                           unroll=(channels <= 8))
    mean = s1 * inv_n
    var = jnp.maximum(s2 * inv_n - mean * mean, 0.0)   # E[x^2]-mean^2, clamped
    inv = lax.rsqrt(var + eps)

    @pl.loop(0, channels, unroll=(channels <= 8))
    def _(c):
        xc = x_ref[0, c].astype(jnp.float32)
        o_ref[0, c] = ((xc - mean) * inv * w_ref[c] + b_ref[c]).astype(o_ref.dtype)


# ------------------------------------------------------------------------
# pallas_call wrappers
# ------------------------------------------------------------------------
def _layernorm_lane(x2d, weight, bias, eps):
    """x2d: (M, C); normalize over the last (lane) dim."""
    M, C = x2d.shape
    budget, limit, target_x = _vmem_params()
    itemsize = x2d.dtype.itemsize
    row_ws = C * (4 * itemsize + 2 * 4)     # 2x dbl-buffered io + ~2 f32 copies
    row_x = C * itemsize
    tile_m = _pick_tile_rows(M, row_ws, row_x, 8, budget, target_x)
    grid = (pl.cdiv(M, tile_m),)
    kernel = functools.partial(_ln_lane_kernel, eps=eps, inv_n=1.0 / C)
    return pl.pallas_call(
        kernel,
        out_shape=jax.ShapeDtypeStruct((M, C), x2d.dtype),
        grid_spec=pltpu.PrefetchScalarGridSpec(
            num_scalar_prefetch=0,
            grid=grid,
            in_specs=[
                pl.BlockSpec((tile_m, C), lambda i: (i, 0)),
                pl.BlockSpec((1, C), lambda i: (0, 0)),
                pl.BlockSpec((1, C), lambda i: (0, 0)),
            ],
            out_specs=pl.BlockSpec((tile_m, C), lambda i: (i, 0)),
        ),
        compiler_params=pltpu.CompilerParams(
            dimension_semantics=("parallel",),
            vmem_limit_bytes=limit,
        ),
    )(x2d, weight.reshape(1, C), bias.reshape(1, C))


def _layernorm_lane_packed(x2d, weight, bias, eps):
    """x2d: (M, C) with C < 128, 128 % C == 0, (M*C) % 128 == 0.  Repack the
    contiguous rows into (M*C/128, 128) so every load/store is a full 128-lane
    vector; group sums come from a block-diagonal-ones matmul on the MXU."""
    M, C = x2d.shape
    g = 128 // C
    Mp = (M * C) // 128
    xp = x2d.reshape(Mp, 128)                          # row-major flatten
    w128 = jnp.tile(weight.astype(jnp.float32), g).reshape(1, 128)
    b128 = jnp.tile(bias.astype(jnp.float32), g).reshape(1, 128)
    lane_grp = jnp.arange(128) // C
    gmat = (lane_grp[:, None] == lane_grp[None, :]).astype(jnp.float32)

    budget, limit, target_x = _vmem_params()
    itemsize = x2d.dtype.itemsize
    row_ws = 128 * (4 * itemsize + 2 * 4)
    row_x = 128 * itemsize
    tile_m = _pick_tile_rows(Mp, row_ws, row_x, 8, budget, target_x)
    grid = (pl.cdiv(Mp, tile_m),)
    kernel = functools.partial(_ln_packed_kernel, eps=eps, inv_n=1.0 / C)
    out = pl.pallas_call(
        kernel,
        out_shape=jax.ShapeDtypeStruct((Mp, 128), x2d.dtype),
        grid_spec=pltpu.PrefetchScalarGridSpec(
            num_scalar_prefetch=0,
            grid=grid,
            in_specs=[
                pl.BlockSpec((tile_m, 128), lambda i: (i, 0)),
                pl.BlockSpec((128, 128), lambda i: (0, 0)),
                pl.BlockSpec((1, 128), lambda i: (0, 0)),
                pl.BlockSpec((1, 128), lambda i: (0, 0)),
            ],
            out_specs=pl.BlockSpec((tile_m, 128), lambda i: (i, 0)),
        ),
        compiler_params=pltpu.CompilerParams(
            dimension_semantics=("parallel",),
            vmem_limit_bytes=limit,
        ),
    )(xp, gmat, w128, b128)
    return out.reshape(M, C)


def _layernorm_cf(x4d, weight, bias, eps):
    """x4d: (B, C, H, W) NCHW; normalize over the channel dim (axis=1)."""
    B, C, H, W = x4d.shape
    budget, limit, target_x = _vmem_params()
    itemsize = x4d.dtype.itemsize
    # Working set: 2x dbl-buffered in + out at io dtype, plus ~4 f32 spatial
    # stat arrays (s1/s2/mean/inv) — no full-tile f32 copy is materialized.
    per_elem_ws = C * 4 * itemsize + 16
    per_elem_x = C * itemsize
    n = max(1, min(budget // per_elem_ws, target_x // per_elem_x))

    # Prefer keeping the full W (lane) extent inside every block.
    if n >= H * W:
        th, tw = H, W
    elif n >= 8 * W:
        tw = W
        th = _round_down(n // W, 8)
    else:
        th = 8 if H >= 8 else H
        if W > 128 and (n // max(th, 1)) >= 128:
            tw = min(_round_down(n // th, 128), _round_down(W, 128))
        else:
            tw = W

    # Guarantee >= ~4 grid steps for large inputs so the pipeline overlaps.
    steps = B * pl.cdiv(H, th) * pl.cdiv(W, tw)
    if steps < 4 and C * H * W * itemsize >= (4 << 20) and th == H and H >= 32:
        th = _round_up(pl.cdiv(H, 4), 8)

    grid = (B, pl.cdiv(H, th), pl.cdiv(W, tw))
    kernel = functools.partial(_ln_cf_kernel, eps=eps, inv_n=1.0 / C, channels=C)
    return pl.pallas_call(
        kernel,
        out_shape=jax.ShapeDtypeStruct((B, C, H, W), x4d.dtype),
        grid_spec=pltpu.PrefetchScalarGridSpec(
            num_scalar_prefetch=0,
            grid=grid,
            in_specs=[
                pl.BlockSpec((1, C, th, tw), lambda b, i, j: (b, 0, i, j)),
                pl.BlockSpec(memory_space=pltpu.MemorySpace.SMEM),
                pl.BlockSpec(memory_space=pltpu.MemorySpace.SMEM),
            ],
            out_specs=pl.BlockSpec((1, C, th, tw), lambda b, i, j: (b, 0, i, j)),
        ),
        compiler_params=pltpu.CompilerParams(
            dimension_semantics=("parallel", "parallel", "parallel"),
            vmem_limit_bytes=limit,
        ),
    )(x4d, weight.astype(jnp.float32), bias.astype(jnp.float32))


def layer_norm(x, weight, bias, eps=1e-8, data_format="channels_last"):
    if data_format not in ("channels_last", "channels_first"):
        raise NotImplementedError
    if data_format == "channels_last":
        # F.layer_norm semantics: normalize over the last dim.
        C = x.shape[-1]
        lead = x.shape[:-1]
        M = 1
        for s in lead:
            M *= s
        x2d = x.reshape(M, C)
        if C < 128 and 128 % C == 0 and (M * C) % 128 == 0:
            y2d = _layernorm_lane_packed(x2d, weight, bias, eps)
        else:
            # TODO(synk): C < 128 without 128 % C == 0 still runs with masked
            # (C-wide) lane stores; a general repack needs an in-kernel lane
            # relayout.
            y2d = _layernorm_lane(x2d, weight, bias, eps)
        return y2d.reshape(*lead, C)
    else:
        if x.ndim != 4:
            # The module's channels_first path is NCHW-only (weight[:,None,None]).
            raise NotImplementedError
        return _layernorm_cf(x, weight, bias, eps)


# ------------------------------------------------------------------------
# Pure-JAX reference (mirrors the PyTorch module's forward)
# ------------------------------------------------------------------------
def _reference(x, weight, bias, eps, data_format):
    if data_format == "channels_last":
        u = jnp.mean(x, axis=-1, keepdims=True)
        s = jnp.mean((x - u) ** 2, axis=-1, keepdims=True)
        xn = (x - u) / jnp.sqrt(s + eps)
        return weight * xn + bias
    else:
        u = jnp.mean(x, axis=1, keepdims=True)
        s = jnp.mean((x - u) ** 2, axis=1, keepdims=True)
        xn = (x - u) / jnp.sqrt(s + eps)
        return weight[None, :, None, None] * xn + bias[None, :, None, None]


if __name__ == "__main__":
    key = jax.random.PRNGKey(0)
    k1, k2, k3, k4, kw, kb, kw2, kb2 = jax.random.split(key, 8)

    eps = 1e-8

    # Small shapes consistent with the module: NCHW (B, C, H, W) = (2, 4, 16, 16).
    B, C, H, W = 2, 4, 16, 16
    weight = jax.random.uniform(kw, (C,), dtype=jnp.float32)   # ~ torch.rand(C)
    bias = jax.random.normal(kb, (C,), dtype=jnp.float32)      # ~ torch.randn(C)

    x_cf = jax.random.normal(k1, (B, C, H, W), dtype=jnp.float32)   # NCHW
    x_cl = jax.random.normal(k2, (B, H, W, C), dtype=jnp.float32)   # NHWC

    y_cf = jax.block_until_ready(layer_norm(x_cf, weight, bias, eps, "channels_first"))
    y_cl = jax.block_until_ready(layer_norm(x_cl, weight, bias, eps, "channels_last"))

    assert y_cf.shape == x_cf.shape
    assert y_cl.shape == x_cl.shape
    assert jnp.allclose(y_cf, _reference(x_cf, weight, bias, eps, "channels_first"),
                        atol=2e-5, rtol=2e-5)
    assert jnp.allclose(y_cl, _reference(x_cl, weight, bias, eps, "channels_last"),
                        atol=2e-5, rtol=2e-5)

    # Wider channels: exercises the plain lane-dense reduce (C >= 128) and the
    # direct 4-D NCHW path with many channel planes.
    C2 = 256
    weight2 = jax.random.uniform(kw2, (C2,), dtype=jnp.float32)
    bias2 = jax.random.normal(kb2, (C2,), dtype=jnp.float32)
    x_cf2 = jax.random.normal(k3, (2, C2, 8, 8), dtype=jnp.float32)
    x_cl2 = jax.random.normal(k4, (2, 8, 8, C2), dtype=jnp.float32)

    y_cf2 = jax.block_until_ready(layer_norm(x_cf2, weight2, bias2, eps, "channels_first"))
    y_cl2 = jax.block_until_ready(layer_norm(x_cl2, weight2, bias2, eps, "channels_last"))

    assert jnp.allclose(y_cf2, _reference(x_cf2, weight2, bias2, eps, "channels_first"),
                        atol=2e-5, rtol=2e-5)
    assert jnp.allclose(y_cl2, _reference(x_cl2, weight2, bias2, eps, "channels_last"),
                        atol=2e-5, rtol=2e-5)

    print("KERNEL_OK")
</pallas_src>

<mosaic_0001>
module attributes {stable_mosaic.version = 11 : i64} {
  func.func @_ln_cf_kernel(%arg0: i32, %arg1: i32, %arg2: i32, %arg3: memref<1x4x16x16xf32, #tpu.memory_space<vmem>>, %arg4: memref<4xf32, #tpu.memory_space<smem>>, %arg5: memref<4xf32, #tpu.memory_space<smem>>, %arg6: memref<1x4x16x16xf32, #tpu.memory_space<vmem>>) attributes {dimension_semantics = [#tpu.dimension_semantics<parallel>, #tpu.dimension_semantics<parallel>, #tpu.dimension_semantics<parallel>], iteration_bounds = array<i64: 2, 1, 1>, scalar_prefetch = 0 : i64, scratch_operands = 0 : i64, tpu.core_type = #tpu.core_type<tc>, window_params = [{transform_indices = @transform_0, window_bounds = array<i64: 1, 4, 16, 16>}, {transform_indices = @transform_1, window_bounds = array<i64: 4>}, {transform_indices = @transform_2, window_bounds = array<i64: 4>}, {transform_indices = @transform_3, window_bounds = array<i64: 1, 4, 16, 16>}]} {
    %cst = arith.constant 0.000000e+00 : f32
    %0 = vector.broadcast %cst : f32 to vector<16x16xf32>
    %c0_i32 = arith.constant 0 : i32
    %c0 = arith.constant 0 : index
    %1 = arith.index_cast %c0_i32 : i32 to index
    %c0_0 = arith.constant 0 : index
    %c0_1 = arith.constant 0 : index
    %2 = vector.load %arg3[%c0, %1, %c0_0, %c0_1] : memref<1x4x16x16xf32, #tpu.memory_space<vmem>>, vector<1x1x16x16xf32>
    %3 = vector.shape_cast %2 : vector<1x1x16x16xf32> to vector<16x16xf32>
    %4 = arith.addf %0, %3 : vector<16x16xf32>
    %5 = arith.mulf %3, %3 : vector<16x16xf32>
    %6 = arith.addf %0, %5 : vector<16x16xf32>
    %c1_i32 = arith.constant 1 : i32
    %c0_2 = arith.constant 0 : index
    %7 = arith.index_cast %c1_i32 : i32 to index
    %c0_3 = arith.constant 0 : index
    %c0_4 = arith.constant 0 : index
    %8 = vector.load %arg3[%c0_2, %7, %c0_3, %c0_4] : memref<1x4x16x16xf32, #tpu.memory_space<vmem>>, vector<1x1x16x16xf32>
    %9 = vector.shape_cast %8 : vector<1x1x16x16xf32> to vector<16x16xf32>
    %10 = arith.addf %4, %9 : vector<16x16xf32>
    %11 = arith.mulf %9, %9 : vector<16x16xf32>
    %12 = arith.addf %6, %11 : vector<16x16xf32>
    %c2_i32 = arith.constant 2 : i32
    %c0_5 = arith.constant 0 : index
    %13 = arith.index_cast %c2_i32 : i32 to index
    %c0_6 = arith.constant 0 : index
    %c0_7 = arith.constant 0 : index
    %14 = vector.load %arg3[%c0_5, %13, %c0_6, %c0_7] : memref<1x4x16x16xf32, #tpu.memory_space<vmem>>, vector<1x1x16x16xf32>
    %15 = vector.shape_cast %14 : vector<1x1x16x16xf32> to vector<16x16xf32>
    %16 = arith.addf %10, %15 : vector<16x16xf32>
    %17 = arith.mulf %15, %15 : vector<16x16xf32>
    %18 = arith.addf %12, %17 : vector<16x16xf32>
    %c3_i32 = arith.constant 3 : i32
    %c0_8 = arith.constant 0 : index
    %19 = arith.index_cast %c3_i32 : i32 to index
    %c0_9 = arith.constant 0 : index
    %c0_10 = arith.constant 0 : index
    %20 = vector.load %arg3[%c0_8, %19, %c0_9, %c0_10] : memref<1x4x16x16xf32, #tpu.memory_space<vmem>>, vector<1x1x16x16xf32>
    %21 = vector.shape_cast %20 : vector<1x1x16x16xf32> to vector<16x16xf32>
    %22 = arith.addf %16, %21 : vector<16x16xf32>
    %23 = arith.mulf %21, %21 : vector<16x16xf32>
    %24 = arith.addf %18, %23 : vector<16x16xf32>
    %c4_i32 = arith.constant 4 : i32
    %cst_11 = arith.constant 2.500000e-01 : f32
    %25 = vector.broadcast %cst_11 : f32 to vector<16x16xf32>
    %26 = arith.mulf %22, %25 : vector<16x16xf32>
    %cst_12 = arith.constant 2.500000e-01 : f32
    %27 = vector.broadcast %cst_12 : f32 to vector<16x16xf32>
    %28 = arith.mulf %24, %27 : vector<16x16xf32>
    %29 = arith.mulf %26, %26 : vector<16x16xf32>
    %30 = arith.subf %28, %29 : vector<16x16xf32>
    %cst_13 = arith.constant 0.000000e+00 : f32
    %31 = vector.broadcast %cst_13 : f32 to vector<16x16xf32>
    %32 = arith.maximumf %30, %31 : vector<16x16xf32>
    %cst_14 = arith.constant 9.99999993E-9 : f32
    %33 = vector.broadcast %cst_14 : f32 to vector<16x16xf32>
    %34 = arith.addf %32, %33 : vector<16x16xf32>
    %35 = math.rsqrt %34 : vector<16x16xf32>
    %c0_i32_15 = arith.constant 0 : i32
    %c1_i32_16 = arith.constant 1 : i32
    %36 = arith.muli %c0_i32_15, %c1_i32_16 : i32
    %c0_i32_17 = arith.constant 0 : i32
    %37 = arith.addi %c0_i32_17, %36 : i32
    %c0_18 = arith.constant 0 : index
    %38 = arith.index_cast %37 : i32 to index
    %c0_19 = arith.constant 0 : index
    %c0_20 = arith.constant 0 : index
    %39 = vector.load %arg3[%c0_18, %38, %c0_19, %c0_20] : memref<1x4x16x16xf32, #tpu.memory_space<vmem>>, vector<1x1x16x16xf32>
    %40 = vector.shape_cast %39 : vector<1x1x16x16xf32> to vector<16x16xf32>
    %41 = arith.subf %40, %26 : vector<16x16xf32>
    %42 = arith.mulf %41, %35 : vector<16x16xf32>
    %43 = arith.index_cast %37 : i32 to index
    %44 = memref.load %arg4[%43] : memref<4xf32, #tpu.memory_space<smem>>
    %45 = vector.broadcast %44 : f32 to vector<16x16xf32>
    %46 = arith.mulf %42, %45 : vector<16x16xf32>
    %47 = arith.index_cast %37 : i32 to index
    %48 = memref.load %arg5[%47] : memref<4xf32, #tpu.memory_space<smem>>
    %49 = vector.broadcast %48 : f32 to vector<16x16xf32>
    %50 = arith.addf %46, %49 : vector<16x16xf32>
    %c0_21 = arith.constant 0 : index
    %51 = arith.index_cast %37 : i32 to index
    %c0_22 = arith.constant 0 : index
    %c0_23 = arith.constant 0 : index
    %52 = vector.load %arg6[%c0_21, %51, %c0_22, %c0_23] : memref<1x4x16x16xf32, #tpu.memory_space<vmem>>, vector<1x1x16x16xf32>
    %53 = vector.shape_cast %52 : vector<1x1x16x16xf32> to vector<16x16xf32>
    %54 = vector.shape_cast %50 : vector<16x16xf32> to vector<1x1x16x16xf32>
    tpu.vector_store %arg6[%c0_21, %51, %c0_22, %c0_23], %54 {strides = array<i32>} : memref<1x4x16x16xf32, #tpu.memory_space<vmem>>, vector<1x1x16x16xf32>,
    %c1_i32_24 = arith.constant 1 : i32
    %c1_i32_25 = arith.constant 1 : i32
    %55 = arith.muli %c1_i32_24, %c1_i32_25 : i32
    %c0_i32_26 = arith.constant 0 : i32
    %56 = arith.addi %c0_i32_26, %55 : i32
    %c0_27 = arith.constant 0 : index
    %57 = arith.index_cast %56 : i32 to index
    %c0_28 = arith.constant 0 : index
    %c0_29 = arith.constant 0 : index
    %58 = vector.load %arg3[%c0_27, %57, %c0_28, %c0_29] : memref<1x4x16x16xf32, #tpu.memory_space<vmem>>, vector<1x1x16x16xf32>
    %59 = vector.shape_cast %58 : vector<1x1x16x16xf32> to vector<16x16xf32>
    %60 = arith.subf %59, %26 : vector<16x16xf32>
    %61 = arith.mulf %60, %35 : vector<16x16xf32>
    %62 = arith.index_cast %56 : i32 to index
    %63 = memref.load %arg4[%62] : memref<4xf32, #tpu.memory_space<smem>>
    %64 = vector.broadcast %63 : f32 to vector<16x16xf32>
    %65 = arith.mulf %61, %64 : vector<16x16xf32>
    %66 = arith.index_cast %56 : i32 to index
    %67 = memref.load %arg5[%66] : memref<4xf32, #tpu.memory_space<smem>>
    %68 = vector.broadcast %67 : f32 to vector<16x16xf32>
    %69 = arith.addf %65, %68 : vector<16x16xf32>
    %c0_30 = arith.constant 0 : index
    %70 = arith.index_cast %56 : i32 to index
    %c0_31 = arith.constant 0 : index
    %c0_32 = arith.constant 0 : index
    %71 = vector.load %arg6[%c0_30, %70, %c0_31, %c0_32] : memref<1x4x16x16xf32, #tpu.memory_space<vmem>>, vector<1x1x16x16xf32>
    %72 = vector.shape_cast %71 : vector<1x1x16x16xf32> to vector<16x16xf32>
    %73 = vector.shape_cast %69 : vector<16x16xf32> to vector<1x1x16x16xf32>
    tpu.vector_store %arg6[%c0_30, %70, %c0_31, %c0_32], %73 {strides = array<i32>} : memref<1x4x16x16xf32, #tpu.memory_space<vmem>>, vector<1x1x16x16xf32>,
    %c2_i32_33 = arith.constant 2 : i32
    %c1_i32_34 = arith.constant 1 : i32
    %74 = arith.muli %c2_i32_33, %c1_i32_34 : i32
    %c0_i32_35 = arith.constant 0 : i32
    %75 = arith.addi %c0_i32_35, %74 : i32
    %c0_36 = arith.constant 0 : index
    %76 = arith.index_cast %75 : i32 to index
    %c0_37 = arith.constant 0 : index
    %c0_38 = arith.constant 0 : index
    %77 = vector.load %arg3[%c0_36, %76, %c0_37, %c0_38] : memref<1x4x16x16xf32, #tpu.memory_space<vmem>>, vector<1x1x16x16xf32>
    %78 = vector.shape_cast %77 : vector<1x1x16x16xf32> to vector<16x16xf32>
    %79 = arith.subf %78, %26 : vector<16x16xf32>
    %80 = arith.mulf %79, %35 : vector<16x16xf32>
    %81 = arith.index_cast %75 : i32 to index
    %82 = memref.load %arg4[%81] : memref<4xf32, #tpu.memory_space<smem>>
    %83 = vector.broadcast %82 : f32 to vector<16x16xf32>
    %84 = arith.mulf %80, %83 : vector<16x16xf32>
    %85 = arith.index_cast %75 : i32 to index
    %86 = memref.load %arg5[%85] : memref<4xf32, #tpu.memory_space<smem>>
    %87 = vector.broadcast %86 : f32 to vector<16x16xf32>
    %88 = arith.addf %84, %87 : vector<16x16xf32>
    %c0_39 = arith.constant 0 : index
    %89 = arith.index_cast %75 : i32 to index
    %c0_40 = arith.constant 0 : index
    %c0_41 = arith.constant 0 : index
    %90 = vector.load %arg6[%c0_39, %89, %c0_40, %c0_41] : memref<1x4x16x16xf32, #tpu.memory_space<vmem>>, vector<1x1x16x16xf32>
    %91 = vector.shape_cast %90 : vector<1x1x16x16xf32> to vector<16x16xf32>
    %92 = vector.shape_cast %88 : vector<16x16xf32> to vector<1x1x16x16xf32>
    tpu.vector_store %arg6[%c0_39, %89, %c0_40, %c0_41], %92 {strides = array<i32>} : memref<1x4x16x16xf32, #tpu.memory_space<vmem>>, vector<1x1x16x16xf32>,
    %c3_i32_42 = arith.constant 3 : i32
    %c1_i32_43 = arith.constant 1 : i32
    %93 = arith.muli %c3_i32_42, %c1_i32_43 : i32
    %c0_i32_44 = arith.constant 0 : i32
    %94 = arith.addi %c0_i32_44, %93 : i32
    %c0_45 = arith.constant 0 : index
    %95 = arith.index_cast %94 : i32 to index
    %c0_46 = arith.constant 0 : index
    %c0_47 = arith.constant 0 : index
    %96 = vector.load %arg3[%c0_45, %95, %c0_46, %c0_47] : memref<1x4x16x16xf32, #tpu.memory_space<vmem>>, vector<1x1x16x16xf32>
    %97 = vector.shape_cast %96 : vector<1x1x16x16xf32> to vector<16x16xf32>
    %98 = arith.subf %97, %26 : vector<16x16xf32>
    %99 = arith.mulf %98, %35 : vector<16x16xf32>
    %100 = arith.index_cast %94 : i32 to index
    %101 = memref.load %arg4[%100] : memref<4xf32, #tpu.memory_space<smem>>
    %102 = vector.broadcast %101 : f32 to vector<16x16xf32>
    %103 = arith.mulf %99, %102 : vector<16x16xf32>
    %104 = arith.index_cast %94 : i32 to index
    %105 = memref.load %arg5[%104] : memref<4xf32, #tpu.memory_space<smem>>
    %106 = vector.broadcast %105 : f32 to vector<16x16xf32>
    %107 = arith.addf %103, %106 : vector<16x16xf32>
    %c0_48 = arith.constant 0 : index
    %108 = arith.index_cast %94 : i32 to index
    %c0_49 = arith.constant 0 : index
    %c0_50 = arith.constant 0 : index
    %109 = vector.load %arg6[%c0_48, %108, %c0_49, %c0_50] : memref<1x4x16x16xf32, #tpu.memory_space<vmem>>, vector<1x1x16x16xf32>
    %110 = vector.shape_cast %109 : vector<1x1x16x16xf32> to vector<16x16xf32>
    %111 = vector.shape_cast %107 : vector<16x16xf32> to vector<1x1x16x16xf32>
    tpu.vector_store %arg6[%c0_48, %108, %c0_49, %c0_50], %111 {strides = array<i32>} : memref<1x4x16x16xf32, #tpu.memory_space<vmem>>, vector<1x1x16x16xf32>,
    %c4_i32_51 = arith.constant 4 : i32
    return
  }
  func.func @transform_0(%arg0: i32, %arg1: i32, %arg2: i32) -> (i32, i32, i32, i32) {
    %c0_i32 = arith.constant 0 : i32
    %c0_i32_0 = arith.constant 0 : i32
    return %arg0, %c0_i32, %arg1, %arg2 : i32, i32, i32, i32
  }
  func.func @transform_1(%arg0: i32, %arg1: i32, %arg2: i32) -> i32 {
    %c0_i32 = arith.constant 0 : i32
    %c0_i32_0 = arith.constant 0 : i32
    return %c0_i32 : i32
  }
  func.func @transform_2(%arg0: i32, %arg1: i32, %arg2: i32) -> i32 {
    %c0_i32 = arith.constant 0 : i32
    %c0_i32_0 = arith.constant 0 : i32
    return %c0_i32 : i32
  }
  func.func @transform_3(%arg0: i32, %arg1: i32, %arg2: i32) -> (i32, i32, i32, i32) {
    %c0_i32 = arith.constant 0 : i32
    %c0_i32_0 = arith.constant 0 : i32
    return %arg0, %c0_i32, %arg1, %arg2 : i32, i32, i32, i32
  }
}

</mosaic_0001>

<bundles_post_ra>
// kernel: tpu_custom_call.1
= control target key start
LH: loop header
LB: loop body
LE: loop exit
PB: predicated region body
PF: predicated region fallthrough
CT: control target
= control target key end

     0   :  { %s1090_s0 = inlined_call_operand.hbm [shape: f32[2,4,16,16], index: 0, kind: input, shape index: {}]   ;;  %s1091_s1 = inlined_call_operand.hbm [shape: f32[4], index: 1, kind: input, shape index: {}]   ;;  %s1092_s2 = inlined_call_operand.vmem [shape: f32[4], index: 2, kind: input, shape index: {}]   ;;  %s1093_s3 = inlined_call_operand.hbm [shape: f32[2,4,16,16], index: 3, kind: output, shape index: {}]  }
   0x1   :  { %1094 = sst [smem:[#allocation14_spill]] %s1091_s1 }
   0x2   :  { %8 = vsyncpa [#allocation3], 0 }
   0x3   :  { %10 = vsyncpa [#allocation3 + $0x1], 0 }
   0x4   :  { %11 = vsyncpa [#allocation5], 0 }
   0x5   :  { %12 = vsyncpa [#allocation6], 0 }
   0x6   :  { %13 = vsyncpa [#allocation4], 0 }
   0x7   :  { %15 = vsyncpa [#allocation4 + $0x1], 0  ;;  %s832_s12 = smov 0   ;;  %s834_s13 = smov 0  }
   0x8   :  { %s836_s14 = smov 0   ;;  %s838_s15 = smov 0  }
   0x9   :  { %s840_s16 = smov 0   ;;  %s842_s17 = smov 0  }
   0xa LB: > { %s518_s18 = sadd.s32 4294967295, %s804_s17   ;;  %s519_s19 = sadd.s32 4294967294, %s804_s17   ;;  %s804_s17 = sphi %s842_s17, %s21_s17   ;;  %s800_s16 = sphi %s840_s16, %s1107_s16   ;;  %s796_s15 = sphi %s838_s15, %s1106_s15   ;;  %s792_s14 = sphi %s836_s14, %s1105_s14   ;;  %s788_s13 = sphi %s834_s13, %s1104_s13   ;;  %s784_s12 = sphi %s832_s12, %s1103_s12  }
   0xb   : > { %s51_s20 = sadd.s32 1, %s792_s14  ;;  %p58_p0 = scmp.ne.s32.totalorder %s792_s14, %s788_s13 }
   0xc   : > { %p59_p1 = scmp.eq.s32.totalorder %s804_s17, 0  ;;  %p64_p2 = scmp.ne.s32.totalorder %s788_s13, %s784_s12 }
   0xd   : > { %p870_p3 = scmp.eq.s32.totalorder %s518_s18, 0  ;;  %p134_p4 = scmp.eq.s32.totalorder %s518_s18, 1 }
   0xe   : > { %p874_p5 = por %p59_p1, %p58_p0  ;;  %p140_p6 = scmp.eq.s32.totalorder %s519_s19, 1 }
   0xf   : > { %p880_p7 = por %p870_p3, %p64_p2  ;;  %p884_p8 = por %p134_p4, %p58_p0 }
  0x10   : > { %p888_p9 = por %p140_p6, %p64_p2  ;;  %p520_p10 = scmp.ge.s32.totalorder %s804_s17, 1 }
  0x11   : > { %p147_p11 = scmp.lt.s32.totalorder %s804_s17, 3  ;;  %s1100_s1 = sld [smem:[#allocation14_spill]] }
  0x12   : > { %p523_p13 = scmp.ge.s32.totalorder %s804_s17, 2  ;;  %p592_p0 = scmp.lt.s32.totalorder %s804_s17, 2 }
  0x13   : > { %p897_p12 = pnand %p520_p10, %p147_p11  ;;  %s169_s5 = sshll.u32 %s1092_s2, 4  ;;  %s170_s5 = int_to_ptr.vmem [resolvable:$true] %s169_s5 }
  0x14   : > { %p910_p2 = pnand %p592_p0, %p874_p5  ;;  %s806_s7 = smov [#allocation7]  }
  0x15   : > { %p575_p1 = pneg %p897_p12  ;;  %s807_s8 = smov [#allocation8]  }
  0x16   : > { %s40_s9 = sadd.s32 1, %s800_s16  ;;  %s180_s10 = sand.u32 1, %s792_s14  }
  0x17   : > { %s159_s28 = sshll.u32 %s1100_s1, 4  ;;  %p576_p4 = pnand %p575_p1, %p870_p3  ;;  %s160_s28 = int_to_ptr.hbm [resolvable:$true] %s159_s28 }
  0x18   : > { %p42_p6 = scmp.ge.s32.totalorder %s40_s9, 2  ;;  %s524_s11 = sshll.u32 %s180_s10, 6 }
  0x19   : > { %578 = dma.hbm_to_smem (!%p576_p4), %s160_s28, 16, %s806_s7, [#allocation5]  }
  0x1a   : > { %581 = dma.vmem_to_smem (!%p576_p4), %s170_s5, 16, %s807_s8, [#allocation6]  }
  0x1b   : > { %s561_s18 = sshll.u32 %s800_s16, 6  ;;  %s1109_s9 = smov (%p42_p6, %s40_s9), 0 }
  0x1c   : > { %s192_s26 = scalar_lea.hbm %s1090_s0, %s561_s18  ;;  %s44_s27 = ssub.s32 %s800_s16, %s1109_s9 }
  0x1d   : > { %s193_s30 = sshll.u32 %s192_s26, 4  ;;  %p49_p5 = scmp.eq.s32.totalorder %s44_s27, 0  ;;  %s194_s30 = int_to_ptr.hbm [resolvable:$true] %s193_s30 }
  0x1e   : > { %s184_s28 = scalar_lea.vmem [#allocation2], %s524_s11  ;;  %s181_s7 = scalar_lea.sflag [#allocation3], %s180_s10 }
  0x1f   : > { %s195_s4 = sshll.u32 %s184_s28, 4  ;;  %s808_s8 = smov 128   ;;  %s196_s4 = int_to_ptr.vmem [resolvable:$true] %s195_s4 }
  0x20   : > { %s929_s5 = scalar_select %p49_p5, %s792_s14, %s51_s20  }
  0x21   : > { %s809_s1 = smov 8   ;;  %207 = sbr.rel (%p897_p12) target bundleno = 97 (0x61), region = 32 }
  0x22   : > { %585 = dma.hbm_to_vmem [thread:$0]  (!%p910_p2), %s194_s30, 1024, %s196_s4, %s181_s7, %s808_s8, %s808_s8, %s809_s1  }
  0x23   : > { %s936_s18 = sand.u32 (!%p897_p12), 1, %s788_s13  }
  0x24   : > { %s528_s11 = sshll.u32 (!%p897_p12), %s936_s18, 6  ;;  %s210_s19 = scalar_lea.sflag (!%p897_p12), [#allocation3], %s936_s18 }
  0x25   : > { %s213_s20 = scalar_lea.vmem (!%p897_p12), [#allocation2], %s528_s11 }
  0x26   : > { %767 = dma.done.wait (%p880_p7), %s210_s19, 1024  }
  0x27   : > { %769 = vsyncadd (%p880_p7), %s210_s19, 4294966272 }
  0x28   : > { %771 = dma.done.wait (%p870_p3), [#allocation5], 16  }
  0x29   : > { %773 = vsyncadd (%p870_p3), [#allocation5], 4294967280 }
  0x2a   : > { %775 = dma.done.wait (%p870_p3), [#allocation6], 16  }
  0x2b   : > { %777 = vsyncadd (%p870_p3), [#allocation6], 4294967280 }
  0x2c   : > { %229 = sfence }
  0x2d   : > { %v954_v0 = vld [vmem:[%s213_s20] sm:$0xff]  ;;  %v956_v1 = vld [vmem:[%s213_s20 + $0x10] sm:$0xff]  ;;  %v970_v8 = vld [vmem:[%s213_s20 + $0x8] sm:$0xff]  ;;  %s1002_s1 = sld [smem:[#allocation7]]  ;;  %vm329_vm6 = vcmask 130048   ;;  %s562_s27 = sshll.u32 %s796_s15, 6 }
  0x2e   : > { %v958_v2 = vld [vmem:[%s213_s20 + $0x20] sm:$0xff]  ;;  %v254_v3 = vmul.f32 %v954_v0, %v954_v0  ;;  %v261_v4 = vadd.f32 %v956_v1, %v954_v0  ;;  %v263_v5 = vmul.f32 %v956_v1, %v956_v1  ;;  %v968_v7 = vld [vmem:[%s213_s20 + $0x30] sm:$0xff]  ;;  %v972_v9 = vld [vmem:[%s213_s20 + $0x18] sm:$0xff]  ;;  %v255_v10 = vmul.f32 %v970_v8, %v970_v8  ;;  %s1004_s21 = sld [smem:[#allocation8]]  ;;  %s398_s4 = scalar_lea.hbm %s1093_s3, %s562_s27 }
  0x2f   : > { %v272_v6 = vmul.f32 %v958_v2, %v958_v2  ;;  %v262_v11 = vadd.f32 %v972_v9, %v970_v8  ;;  %v264_v12 = vmul.f32 %v972_v9, %v972_v9  ;;  %v980_v13 = vld [vmem:[%s213_s20 + $0x28] sm:$0xff]  ;;  %v982_v14 = vld [vmem:[%s213_s20 + $0x38] sm:$0xff]  ;;  %v281_v17 = vmul.f32 %v968_v7, %v968_v7  ;;  %s1006_s23 = sld [smem:[#allocation7 + $0x1]]  ;;  %s247_s15 = scalar_lea.vmem [#allocation9], %s528_s11 }
  0x30   : > { %v265_v15 = vadd.f32 %v263_v5, %v254_v3  ;;  %v270_v16 = vadd.f32 %v958_v2, %v261_v4  ;;  %v273_v18 = vmul.f32 %v980_v13, %v980_v13  ;;  %v282_v21 = vmul.f32 %v982_v14, %v982_v14  ;;  %s1008_s29 = sld [smem:[#allocation8 + $0x1]]  ;;  %s399_s7 = sshll.u32 %s247_s15, 4  ;;  %s400_s7 = int_to_ptr.vmem [resolvable:$true] %s399_s7 }
  0x31   : > { %v266_v19 = vadd.f32 %v264_v12, %v255_v10  ;;  %v271_v20 = vadd.f32 %v980_v13, %v262_v11  ;;  %s1010_s6 = sld [smem:[#allocation7 + $0x2]]  ;;  %s401_s8 = sshll.u32 %s398_s4, 4  ;;  %s402_s8 = int_to_ptr.hbm [resolvable:$true] %s401_s8 }
  0x32   : > { %v274_v22 = vadd.f32 %v272_v6, %v265_v15  ;;  %v279_v23 = vadd.f32 %v968_v7, %v270_v16  ;;  %s1012_s10 = sld [smem:[#allocation7 + $0x3]]  ;;  %s384_s11 = scalar_lea.sflag [#allocation4], %s936_s18 }
  0x33   : > { %v275_v24 = vadd.f32 %v273_v18, %v266_v19  ;;  %v280_v25 = vadd.f32 %v982_v14, %v271_v20  ;;  %v322_v50 = vstv %s1002_s1  ;;  %s1018_s22 = sld [smem:[#allocation8 + $0x2]]  ;;  %s728_s19 = sshra.s32 %s402_s8, 4  ;;  %s729_s19 = int_to_ptr.hbm [resolvable:$true] %s728_s19 }
  0x34   : > { %v283_v26 = vadd.f32 %v281_v17, %v274_v22  ;;  %v994_v27 = vmul.f32 0.25, %v279_v23  ;;  %v326_v51 = vstv %s1004_s21  ;;  %s1032_s26 = sld [smem:[#allocation8 + $0x3]]  ;;  %s730_s20 = scalar_lea.hbm %s729_s19, 64 }
  0x35   : > { %v284_v28 = vadd.f32 %v282_v21, %v275_v24  ;;  %v996_v29 = vmul.f32 0.25, %v280_v25  ;;  %v339_v61 = vstv %s1006_s23  ;;  %p731_p3 = scmp.ne.s32.totalorder %s729_s19, %s730_s20  ;;  %s734_s23 = scalar_lea.hbm %s1093_s3, 128 }
  0x36   : > { %v287_v30 = vmul.f32 0.25, %v283_v26  ;;  %v289_v31 = vmul.f32 %v994_v27, %v994_v27  ;;  %v317_v49 = vsub.f32 %v954_v0, %v994_v27  ;;  %v334_v54 = vsub.f32 %v956_v1, %v994_v27  ;;  %p735_p11 = scmp.lt.s32.totalorder %s729_s19, %s1093_s3  ;;  %p736_p12 = scmp.lt.s32.totalorder %s734_s23, %s730_s20 }
  0x37   : > { %v288_v32 = vmul.f32 0.25, %v284_v28  ;;  %v290_v33 = vmul.f32 %v996_v29, %v996_v29  ;;  %v318_v53 = vsub.f32 %v970_v8, %v996_v29  ;;  %v351_v55 = vsub.f32 %v958_v2, %v994_v27  ;;  %p732_p7 = pnand %p731_p3, %p884_p8 }
  0x38   : > { %v291_v34 = vsub.f32 %v287_v30, %v289_v31  ;;  %v335_v57 = vsub.f32 %v972_v9, %v996_v29  ;;  %v352_v58 = vsub.f32 %v980_v13, %v996_v29  ;;  %v368_v59 = vsub.f32 %v968_v7, %v994_v27  ;;  %p737_p0 = por %p736_p12, %p735_p11 }
  0x39   : > { %v292_v35 = vsub.f32 %v288_v32, %v290_v33  ;;  %v369_v62 = vsub.f32 %v982_v14, %v996_v29  ;;  %v343_v0 = vstv %s1008_s29  ;;  %v356_v1 = vstv %s1010_s6  ;;  %p733_p10 = pneg %p732_p7 }
  0x3a   : > { %v293_v36 = vmax.f32 %v291_v34, 0.0  ;;  %v373_v2 = vstv %s1012_s10  ;;  %v360_v17 = vstv %s1018_s22  ;;  %v377_v24 = vstv %s1032_s26 }
  0x3b   : > { %v294_v37 = vmax.f32 %v292_v35, 0.0  ;;  %p738_p1 = pnand %p737_p0, %p733_p10 }
  0x3c   : > { %v295_v38 = vadd.f32 1e-08, %v293_v36 }
  0x3d   : > { %v296_v39 = vadd.f32 1e-08, %v294_v37 }
  0x3e   : > { %650 = vrsqrt.f32 %v295_v38  ;;  %vm303_vm0 = vweird.f32 %v295_v38 }
  0x3f   : > { %652 = vrsqrt.f32 %v296_v39  ;;  %vm313_vm2 = vweird.f32 %v296_v39 }
  0x44   : > { %v651_v40 = vpop.eup %650 }
  0x45   : > { %v653_v41 = vpop.eup %652  ;;  %v298_v42 = vmul.f32 %v651_v40, %v295_v38  ;;  %vm304_vm1 = vweird.f32 %v651_v40 }
  0x46   : > { %v308_v43 = vmul.f32 %v653_v41, %v296_v39  ;;  %vm314_vm3 = vweird.f32 %v653_v41  ;;  %vm305_vm4 = vmor %vm303_vm0, %vm304_vm1 }
  0x47   : > { %v299_v44 = vmul.f32 %v651_v40, %v298_v42  ;;  %vm315_vm5 = vmor %vm313_vm2, %vm314_vm3 }
  0x48   : > { %v309_v45 = vmul.f32 %v653_v41, %v308_v43 }
  0x49   : > { %v300_v46 = vmul.f32 0.5, %v299_v44 }
  0x4a   : > { %v310_v47 = vmul.f32 0.5, %v309_v45 }
  0x4b   : > { %v301_v48 = vsub.f32 1.5, %v300_v46 }
  0x4c   : > { %v311_v52 = vsub.f32 1.5, %v310_v47 }
  0x4d   : > { %v302_v56 = vmul.f32 %v651_v40, %v301_v48 }
  0x4e   : > { %v312_v60 = vmul.f32 %v653_v41, %v311_v52 }
  0x4f   : > { %v306_v63 = vsel %vm305_vm4, %v651_v40, %v302_v56 }
  0x50   : > { %v319_v3 = vmul.f32 %v317_v49, %v306_v63  ;;  %v316_v4 = vsel %vm315_vm5, %v653_v41, %v312_v60  ;;  %v336_v5 = vmul.f32 %v334_v54, %v306_v63  ;;  %v353_v6 = vmul.f32 %v351_v55, %v306_v63 }
  0x51   : > { %v320_v8 = vmul.f32 %v318_v53, %v316_v4  ;;  %v337_v7 = vmul.f32 %v335_v57, %v316_v4  ;;  %v354_v9 = vmul.f32 %v352_v58, %v316_v4  ;;  %v370_v10 = vmul.f32 %v368_v59, %v306_v63 }
  0x52   : > { %v323_v11 = vmul.f32 %v322_v50, %v319_v3  ;;  %v340_v12 = vmul.f32 %v339_v61, %v336_v5  ;;  %v357_v13 = vmul.f32 %v356_v1, %v353_v6  ;;  %v371_v14 = vmul.f32 %v369_v62, %v316_v4 }
  0x53   : > { %v324_v15 = vmul.f32 %v322_v50, %v320_v8  ;;  %v341_v16 = vmul.f32 %v339_v61, %v337_v7  ;;  %v358_v18 = vmul.f32 %v356_v1, %v354_v9  ;;  %v374_v21 = vmul.f32 %v373_v2, %v370_v10 }
  0x54   : > { %v327_v19 = vadd.f32 %v326_v51, %v323_v11  ;;  %v344_v20 = vadd.f32 %v343_v0, %v340_v12  ;;  %v375_v25 = vmul.f32 %v373_v2, %v371_v14  ;;  %v361_v26 = vadd.f32 %v360_v17, %v357_v13 }
  0x55   : > { %v328_v22 = vadd.f32 %v326_v51, %v324_v15  ;;  %v345_v23 = vadd.f32 %v343_v0, %v341_v16  ;;  %v362_v27 = vadd.f32 %v360_v17, %v358_v18  ;;  %v378_v28 = vadd.f32 %v377_v24, %v374_v21 }
  0x56   : > { %330 = vst.msk [vmem:[%s247_s15] sm:$0xff] %vm329_vm6, %v327_v19  ;;  %v379_v29 = vadd.f32 %v377_v24, %v375_v25 }
  0x57   : > { %331 = vst.msk [vmem:[%s247_s15 + $0x8] sm:$0xff] %vm329_vm6, %v328_v22 }
  0x58   : > { %542 = vst.msk [vmem:[%s247_s15 + $0x10] sm:$0xff] %vm329_vm6, %v344_v20 }
  0x59   : > { %543 = vst.msk [vmem:[%s247_s15 + $0x18] sm:$0xff] %vm329_vm6, %v345_v23 }
  0x5a   : > { %548 = vst.msk [vmem:[%s247_s15 + $0x20] sm:$0xff] %vm329_vm6, %v361_v26 }
  0x5b   : > { %549 = vst.msk [vmem:[%s247_s15 + $0x28] sm:$0xff] %vm329_vm6, %v362_v27 }
  0x5c   : > { %554 = vst.msk [vmem:[%s247_s15 + $0x30] sm:$0xff] %vm329_vm6, %v378_v28 }
  0x5d   : > { %555 = vst.msk [vmem:[%s247_s15 + $0x38] sm:$0xff] %vm329_vm6, %v379_v29 }
  0x5e   : > { %741 = shalt.err (!%p738_p1)
}
  0x5f   : > { %s810_s18 = smov 128   ;;  %s811_s10 = smov 8  }
  0x60   : > { %573 = dma.vmem_to_hbm [thread:$0]  (%p884_p8), %s400_s7, 1024, %s402_s8, %s384_s11, %s810_s18, %s810_s18, %s811_s10  }
  0x61 PF: > { %s416_s22 = sand.u32 1, %s784_s12   ;;  %p587_p2 = pnand %p523_p13, %p888_p9 }
  0x62   : > { %s417_s26 = scalar_lea.sflag [#allocation4], %s416_s22 }
  0x63   : > { %p588_p4 = pneg %p587_p2 }
  0x65   : > { %779 = dma.done.wait (%p588_p4), %s417_s26, 1024  }
  0x66   : > { %781 = vsyncadd (%p588_p4), %s417_s26, 4294966272  ;;  %s21_s17 = sadd.s32 1, %s804_s17   ;;  %s1103_s12 = smov %s788_s13 }
  0x67   : > { %p18_p6 = scmp.ge.s32.totalorder %s21_s17, 4   ;;  %s1104_s13 = smov %s792_s14 }
  0x68   : > { %s1105_s14 = smov %s929_s5  ;;  %s1106_s15 = smov %s800_s16 }
  0x69   : > { %s1107_s16 = smov %s1109_s9  ;;  %20 = sbr.rel (!%p18_p6) target bundleno = 10 (0xa), region = 93 }
  0x6e   :  { %423 = vsyncpa [#allocation3], 1 }
  0x6f   :  { %425 = vsyncpa [#allocation3 + $0x1], 1 }
  0x70   :  { %426 = vsyncpa [#allocation4], 1 }
  0x71   :  { %428 = vsyncpa [#allocation4 + $0x1], 1 }
  0x72   :  { %429 = vsyncpa [#allocation5], 1 }
  0x73   :  { %431 = vsyncpa [#allocation5 + $0x1], 1 }
  0x74   :  { %432 = vsyncpa [#allocation6], 1 }
  0x75   :  { %434 = vsyncpa [#allocation6 + $0x1], 1 }

</bundles_post_ra>
